<compile_context>
chip_gen: v6e
topology: v6e:2x2x1
jax: 0.10.0
libtpu: 0.0.40
codegen_flags: <defaults>
</compile_context>

<pallas_src>
import functools

import jax
import jax.numpy as jnp
from jax.experimental import pallas as pl
from jax.experimental.pallas import tpu as pltpu


def _round_up(x, m):
    return (x + m - 1) // m * m


def critic_kernel(h_ref, w1_ref, w2_ref, w3_ref, b_ref, q_ref, *,
                  hidden_dim, num_actions):
    """Fused dueling head for one batch tile.

    h_ref  : (TB, H)        bf16  encoded observations
    w1_ref : (2, H, H)      bf16  [0]=vw1, [1]=aw1
    w2_ref : (2, H, H)      bf16  [0]=vw2, [1]=aw2
    w3_ref : (2, H, Npad)   bf16  [0]: col 0 = vw3 (rest 0); [1]: cols 0..A-1 = aw3 (rest 0)
    b_ref  : (2, 3, BW)     f32   packed biases, [head, layer, :]
    q_ref  : (TB, Npad)     f32   cols 0..A-1 hold q; remaining cols are scratch
    """
    H = hidden_dim
    npad = q_ref.shape[-1]

    h = h_ref[...]                       # (TB, H) bf16
    b = b_ref[...]                       # (2, 3, BW) f32

    def head(i):                         # i is a Python int -> static ref index
        x = jnp.dot(h, w1_ref[i], preferred_element_type=jnp.float32)      # (TB, H)
        x = jnp.maximum(x + b[i, 0, :H], 0.0).astype(jnp.bfloat16)
        x = jnp.dot(x, w2_ref[i], preferred_element_type=jnp.float32)      # (TB, H)
        x = jnp.maximum(x + b[i, 1, :H], 0.0).astype(jnp.bfloat16)
        y = jnp.dot(x, w3_ref[i], preferred_element_type=jnp.float32)      # (TB, Npad)
        return y + b[i, 2, :npad]

    yv = head(0)                         # col 0 = V, other cols exactly 0
    ya = head(1)                         # cols 0..A-1 = A, other cols exactly 0

    v = jnp.sum(yv, axis=1, keepdims=True)                       # (TB, 1) == V
    a_mean = jnp.sum(ya, axis=1, keepdims=True) * (1.0 / num_actions)
    # Cols 0..A-1 of (ya + v - a_mean) equal v + a - mean(a); rest is discarded junk.
    q_ref[...] = (ya + (v - a_mean)).astype(q_ref.dtype)


def pack_params(params, hidden_dim, num_actions):
    """Pack the 12 per-layer tensors into 3 bf16 stacked weight slabs + 1 f32 bias slab.

    Done once at parameter-load time (outside the jitted forward).
    """
    H = hidden_dim
    npad = _round_up(num_actions, 128)     # lane-dense layer-3 / output width
    bw = max(H, npad)

    w1 = jnp.stack([params["vw1"], params["aw1"]], axis=0)          # (2, H, H)
    w2 = jnp.stack([params["vw2"], params["aw2"]], axis=0)          # (2, H, H)

    w3 = jnp.zeros((2, H, npad), jnp.float32)
    w3 = w3.at[0, :, 0:1].set(params["vw3"])
    w3 = w3.at[1, :, :num_actions].set(params["aw3"])               # (2, H, Npad)

    b = jnp.zeros((2, 3, bw), jnp.float32)
    b = b.at[0, 0, :H].set(params["vb1"][0]).at[0, 1, :H].set(params["vb2"][0])
    b = b.at[0, 2, 0].set(params["vb3"][0, 0])
    b = b.at[1, 0, :H].set(params["ab1"][0]).at[1, 1, :H].set(params["ab2"][0])
    b = b.at[1, 2, :num_actions].set(params["ab3"][0])

    return (w1.astype(jnp.bfloat16), w2.astype(jnp.bfloat16),
            w3.astype(jnp.bfloat16), b)


@functools.partial(jax.jit, static_argnames=("num_actions",))
def critic_forward_encoded(h, packed, *, num_actions):
    """q = V(h) + A(h) - mean(A(h), axis=1, keepdims=True), via the Pallas kernel."""
    w1, w2, w3, bias = packed
    B, H = h.shape
    npad = w3.shape[-1]

    # Batch tiling: pad to a multiple of the batch tile; tile is a multiple of 8.
    bp8 = _round_up(B, 8)
    TB = min(512, bp8)
    b_pad = _round_up(bp8, TB)
    h_p = jnp.zeros((b_pad, H), jnp.bfloat16).at[:B].set(h.astype(jnp.bfloat16))

    kernel = functools.partial(critic_kernel, hidden_dim=H, num_actions=num_actions)

    out = pl.pallas_call(
        kernel,
        out_shape=jax.ShapeDtypeStruct((b_pad, npad), jnp.float32),
        grid=(b_pad // TB,),
        in_specs=[
            pl.BlockSpec((TB, H), lambda i: (i, 0)),                 # h: blocked on batch
            pl.BlockSpec((2, H, H), lambda i: (0, 0, 0)),            # weights: VMEM-resident
            pl.BlockSpec((2, H, H), lambda i: (0, 0, 0)),
            pl.BlockSpec((2, H, npad), lambda i: (0, 0, 0)),
            pl.BlockSpec((2, 3, bias.shape[-1]), lambda i: (0, 0, 0)),  # packed biases
        ],
        out_specs=pl.BlockSpec((TB, npad), lambda i: (i, 0)),
        compiler_params=pltpu.CompilerParams(
            dimension_semantics=("parallel",),                       # megacore / v7x 2-TC split
            vmem_limit_bytes=48 * 1024 * 1024,
        ),
    )(h_p, w1, w2, w3, bias)

    return out[:B, :num_actions]


def init_params(key, hidden_dim, num_actions):
    """Deterministic synthetic init matching the nn.Sequential shapes.

    Weights stored as (in_features, out_features) so y = x @ W + b, equivalent to
    PyTorch's x @ W.T + b with W_torch of shape (out, in).
    """
    ks = jax.random.split(key, 6)

    def lin(kw, fan_in, fan_out):
        scale = 1.0 / jnp.sqrt(jnp.float32(fan_in))
        w = jax.random.normal(kw, (fan_in, fan_out), jnp.float32) * scale
        b = jnp.zeros((1, fan_out), jnp.float32)
        return w, b

    vw1, vb1 = lin(ks[0], hidden_dim, hidden_dim)
    vw2, vb2 = lin(ks[1], hidden_dim, hidden_dim)
    vw3, vb3 = lin(ks[2], hidden_dim, 1)
    aw1, ab1 = lin(ks[3], hidden_dim, hidden_dim)
    aw2, ab2 = lin(ks[4], hidden_dim, hidden_dim)
    aw3, ab3 = lin(ks[5], hidden_dim, num_actions)

    return dict(vw1=vw1, vb1=vb1, vw2=vw2, vb2=vb2, vw3=vw3, vb3=vb3,
                aw1=aw1, ab1=ab1, aw2=aw2, ab2=ab2, aw3=aw3, ab3=ab3)


def reference_forward_encoded(h, p):
    """Pure-JAX f32 reference of the PyTorch forward_encoded."""
    def mlp3(x, w1, b1, w2, b2, w3, b3):
        x = jnp.maximum(x @ w1 + b1, 0.0)
        x = jnp.maximum(x @ w2 + b2, 0.0)
        return x @ w3 + b3
    v = mlp3(h, p["vw1"], p["vb1"], p["vw2"], p["vb2"], p["vw3"], p["vb3"])
    a = mlp3(h, p["aw1"], p["ab1"], p["aw2"], p["ab2"], p["aw3"], p["ab3"])
    return v + a - jnp.mean(a, axis=1, keepdims=True)


def reference_forward_encoded_bf16(h, p):
    """Same math with weights / inputs / activations rounded to bf16 like the kernel."""
    r = lambda x: x.astype(jnp.bfloat16).astype(jnp.float32)

    def mlp3(x, w1, b1, w2, b2, w3, b3):
        x = r(jnp.maximum(x @ r(w1) + b1, 0.0))
        x = r(jnp.maximum(x @ r(w2) + b2, 0.0))
        return x @ r(w3) + b3

    hb = r(h)
    v = mlp3(hb, p["vw1"], p["vb1"], p["vw2"], p["vb2"], p["vw3"], p["vb3"])
    a = mlp3(hb, p["aw1"], p["ab1"], p["aw2"], p["ab2"], p["aw3"], p["ab3"])
    return v + a - jnp.mean(a, axis=1, keepdims=True)


if __name__ == "__main__":
    B, hidden_dim, num_actions = 8, 32, 6

    key = jax.random.PRNGKey(0)
    k_h, k_p = jax.random.split(key)

    h = jax.random.normal(k_h, (B, hidden_dim), jnp.float32)   # encoded obs
    params = init_params(k_p, hidden_dim, num_actions)

    # Packing is done once, at parameter-load time (not inside the jitted forward).
    packed = pack_params(params, hidden_dim, num_actions)

    q = jax.block_until_ready(
        critic_forward_encoded(h, packed, num_actions=num_actions))

    q_ref_bf16 = reference_forward_encoded_bf16(h, params)   # bf16-weight semantics
    q_ref_f32 = reference_forward_encoded(h, params)         # pure f32 module semantics

    assert q.shape == (B, num_actions)
    assert jnp.allclose(q, q_ref_bf16, atol=2e-3, rtol=2e-3), "mismatch vs bf16 reference"
    assert jnp.allclose(q, q_ref_f32, atol=1e-1, rtol=1e-1), "mismatch vs f32 reference"

    print("KERNEL_OK")
</pallas_src>

<mosaic_0001>
module attributes {stable_mosaic.version = 11 : i64} {
  func.func @critic_kernel(%arg0: i32, %arg1: memref<8x32xbf16, #tpu.memory_space<vmem>>, %arg2: memref<2x32x32xbf16, #tpu.memory_space<vmem>>, %arg3: memref<2x32x32xbf16, #tpu.memory_space<vmem>>, %arg4: memref<2x32x128xbf16, #tpu.memory_space<vmem>>, %arg5: memref<2x3x128xf32, #tpu.memory_space<vmem>>, %arg6: memref<8x128xf32, #tpu.memory_space<vmem>>) attributes {dimension_semantics = [#tpu.dimension_semantics<parallel>], iteration_bounds = array<i64: 1>, scalar_prefetch = 0 : i64, scratch_operands = 0 : i64, tpu.core_type = #tpu.core_type<tc>, window_params = [{transform_indices = @transform_0, window_bounds = array<i64: 8, 32>}, {pipeline_mode = #tpu.pipeline_mode<synchronous>, transform_indices = @transform_1, window_bounds = array<i64: 2, 32, 32>}, {pipeline_mode = #tpu.pipeline_mode<synchronous>, transform_indices = @transform_2, window_bounds = array<i64: 2, 32, 32>}, {pipeline_mode = #tpu.pipeline_mode<synchronous>, transform_indices = @transform_3, window_bounds = array<i64: 2, 32, 128>}, {pipeline_mode = #tpu.pipeline_mode<synchronous>, transform_indices = @transform_4, window_bounds = array<i64: 2, 3, 128>}, {transform_indices = @transform_5, window_bounds = array<i64: 8, 128>}]} {
    %c0 = arith.constant 0 : index
    %c0_0 = arith.constant 0 : index
    %0 = vector.load %arg1[%c0, %c0_0] : memref<8x32xbf16, #tpu.memory_space<vmem>>, vector<8x32xbf16>
    %c0_1 = arith.constant 0 : index
    %c0_2 = arith.constant 0 : index
    %c0_3 = arith.constant 0 : index
    %1 = vector.load %arg5[%c0_1, %c0_2, %c0_3] : memref<2x3x128xf32, #tpu.memory_space<vmem>>, vector<2x3x128xf32>
    %c0_4 = arith.constant 0 : index
    %c0_5 = arith.constant 0 : index
    %c0_6 = arith.constant 0 : index
    %2 = vector.load %arg2[%c0_4, %c0_5, %c0_6] : memref<2x32x32xbf16, #tpu.memory_space<vmem>>, vector<1x32x32xbf16>
    %3 = vector.shape_cast %2 : vector<1x32x32xbf16> to vector<32x32xbf16>
    %cst = arith.constant dense<0.000000e+00> : vector<8x32xf32>
    %4 = tpu.matmul %0, %3, %cst {dimension_numbers = #tpu.dot_dimension_numbers<[1], [0], [0], [1], [0, 0, 1, 1], [], []>} : vector<8x32xbf16>, vector<32x32xbf16>, vector<8x32xf32> -> vector<8x32xf32>
    %5 = vector.extract_strided_slice %1 {offsets = [0, 0, 0], sizes = [1, 1, 32], strides = [1, 1, 1]} : vector<2x3x128xf32> to vector<1x1x32xf32>
    %6 = vector.shape_cast %5 : vector<1x1x32xf32> to vector<32xf32>
    %7 = vector.shape_cast %6 : vector<32xf32> to vector<1x32xf32>
    %8 = vector.broadcast %7 : vector<1x32xf32> to vector<8x32xf32>
    %9 = arith.addf %4, %8 : vector<8x32xf32>
    %cst_7 = arith.constant 0.000000e+00 : f32
    %10 = vector.broadcast %cst_7 : f32 to vector<8x32xf32>
    %11 = arith.maximumf %9, %10 : vector<8x32xf32>
    %12 = arith.truncf %11 : vector<8x32xf32> to vector<8x32xbf16>
    %c0_8 = arith.constant 0 : index
    %c0_9 = arith.constant 0 : index
    %c0_10 = arith.constant 0 : index
    %13 = vector.load %arg3[%c0_8, %c0_9, %c0_10] : memref<2x32x32xbf16, #tpu.memory_space<vmem>>, vector<1x32x32xbf16>
    %14 = vector.shape_cast %13 : vector<1x32x32xbf16> to vector<32x32xbf16>
    %cst_11 = arith.constant dense<0.000000e+00> : vector<8x32xf32>
    %15 = tpu.matmul %12, %14, %cst_11 {dimension_numbers = #tpu.dot_dimension_numbers<[1], [0], [0], [1], [0, 0, 1, 1], [], []>} : vector<8x32xbf16>, vector<32x32xbf16>, vector<8x32xf32> -> vector<8x32xf32>
    %16 = vector.extract_strided_slice %1 {offsets = [0, 1, 0], sizes = [1, 1, 32], strides = [1, 1, 1]} : vector<2x3x128xf32> to vector<1x1x32xf32>
    %17 = vector.shape_cast %16 : vector<1x1x32xf32> to vector<32xf32>
    %18 = vector.shape_cast %17 : vector<32xf32> to vector<1x32xf32>
    %19 = vector.broadcast %18 : vector<1x32xf32> to vector<8x32xf32>
    %20 = arith.addf %15, %19 : vector<8x32xf32>
    %cst_12 = arith.constant 0.000000e+00 : f32
    %21 = vector.broadcast %cst_12 : f32 to vector<8x32xf32>
    %22 = arith.maximumf %20, %21 : vector<8x32xf32>
    %23 = arith.truncf %22 : vector<8x32xf32> to vector<8x32xbf16>
    %c0_13 = arith.constant 0 : index
    %c0_14 = arith.constant 0 : index
    %c0_15 = arith.constant 0 : index
    %24 = vector.load %arg4[%c0_13, %c0_14, %c0_15] : memref<2x32x128xbf16, #tpu.memory_space<vmem>>, vector<1x32x128xbf16>
    %25 = vector.shape_cast %24 : vector<1x32x128xbf16> to vector<32x128xbf16>
    %cst_16 = arith.constant dense<0.000000e+00> : vector<8x128xf32>
    %26 = tpu.matmul %23, %25, %cst_16 {dimension_numbers = #tpu.dot_dimension_numbers<[1], [0], [0], [1], [0, 0, 1, 1], [], []>} : vector<8x32xbf16>, vector<32x128xbf16>, vector<8x128xf32> -> vector<8x128xf32>
    %27 = vector.extract_strided_slice %1 {offsets = [0, 2, 0], sizes = [1, 1, 128], strides = [1, 1, 1]} : vector<2x3x128xf32> to vector<1x1x128xf32>
    %28 = vector.shape_cast %27 : vector<1x1x128xf32> to vector<128xf32>
    %29 = vector.shape_cast %28 : vector<128xf32> to vector<1x128xf32>
    %30 = vector.broadcast %29 : vector<1x128xf32> to vector<8x128xf32>
    %31 = arith.addf %26, %30 : vector<8x128xf32>
    %c1 = arith.constant 1 : index
    %c0_17 = arith.constant 0 : index
    %c0_18 = arith.constant 0 : index
    %32 = vector.load %arg2[%c1, %c0_17, %c0_18] : memref<2x32x32xbf16, #tpu.memory_space<vmem>>, vector<1x32x32xbf16>
    %33 = vector.shape_cast %32 : vector<1x32x32xbf16> to vector<32x32xbf16>
    %cst_19 = arith.constant dense<0.000000e+00> : vector<8x32xf32>
    %34 = tpu.matmul %0, %33, %cst_19 {dimension_numbers = #tpu.dot_dimension_numbers<[1], [0], [0], [1], [0, 0, 1, 1], [], []>} : vector<8x32xbf16>, vector<32x32xbf16>, vector<8x32xf32> -> vector<8x32xf32>
    %35 = vector.extract_strided_slice %1 {offsets = [1, 0, 0], sizes = [1, 1, 32], strides = [1, 1, 1]} : vector<2x3x128xf32> to vector<1x1x32xf32>
    %36 = vector.shape_cast %35 : vector<1x1x32xf32> to vector<32xf32>
    %37 = vector.shape_cast %36 : vector<32xf32> to vector<1x32xf32>
    %38 = vector.broadcast %37 : vector<1x32xf32> to vector<8x32xf32>
    %39 = arith.addf %34, %38 : vector<8x32xf32>
    %cst_20 = arith.constant 0.000000e+00 : f32
    %40 = vector.broadcast %cst_20 : f32 to vector<8x32xf32>
    %41 = arith.maximumf %39, %40 : vector<8x32xf32>
    %42 = arith.truncf %41 : vector<8x32xf32> to vector<8x32xbf16>
    %c1_21 = arith.constant 1 : index
    %c0_22 = arith.constant 0 : index
    %c0_23 = arith.constant 0 : index
    %43 = vector.load %arg3[%c1_21, %c0_22, %c0_23] : memref<2x32x32xbf16, #tpu.memory_space<vmem>>, vector<1x32x32xbf16>
    %44 = vector.shape_cast %43 : vector<1x32x32xbf16> to vector<32x32xbf16>
    %cst_24 = arith.constant dense<0.000000e+00> : vector<8x32xf32>
    %45 = tpu.matmul %42, %44, %cst_24 {dimension_numbers = #tpu.dot_dimension_numbers<[1], [0], [0], [1], [0, 0, 1, 1], [], []>} : vector<8x32xbf16>, vector<32x32xbf16>, vector<8x32xf32> -> vector<8x32xf32>
    %46 = vector.extract_strided_slice %1 {offsets = [1, 1, 0], sizes = [1, 1, 32], strides = [1, 1, 1]} : vector<2x3x128xf32> to vector<1x1x32xf32>
    %47 = vector.shape_cast %46 : vector<1x1x32xf32> to vector<32xf32>
    %48 = vector.shape_cast %47 : vector<32xf32> to vector<1x32xf32>
    %49 = vector.broadcast %48 : vector<1x32xf32> to vector<8x32xf32>
    %50 = arith.addf %45, %49 : vector<8x32xf32>
    %cst_25 = arith.constant 0.000000e+00 : f32
    %51 = vector.broadcast %cst_25 : f32 to vector<8x32xf32>
    %52 = arith.maximumf %50, %51 : vector<8x32xf32>
    %53 = arith.truncf %52 : vector<8x32xf32> to vector<8x32xbf16>
    %c1_26 = arith.constant 1 : index
    %c0_27 = arith.constant 0 : index
    %c0_28 = arith.constant 0 : index
    %54 = vector.load %arg4[%c1_26, %c0_27, %c0_28] : memref<2x32x128xbf16, #tpu.memory_space<vmem>>, vector<1x32x128xbf16>
    %55 = vector.shape_cast %54 : vector<1x32x128xbf16> to vector<32x128xbf16>
    %cst_29 = arith.constant dense<0.000000e+00> : vector<8x128xf32>
    %56 = tpu.matmul %53, %55, %cst_29 {dimension_numbers = #tpu.dot_dimension_numbers<[1], [0], [0], [1], [0, 0, 1, 1], [], []>} : vector<8x32xbf16>, vector<32x128xbf16>, vector<8x128xf32> -> vector<8x128xf32>
    %57 = vector.extract_strided_slice %1 {offsets = [1, 2, 0], sizes = [1, 1, 128], strides = [1, 1, 1]} : vector<2x3x128xf32> to vector<1x1x128xf32>
    %58 = vector.shape_cast %57 : vector<1x1x128xf32> to vector<128xf32>
    %59 = vector.shape_cast %58 : vector<128xf32> to vector<1x128xf32>
    %60 = vector.broadcast %59 : vector<1x128xf32> to vector<8x128xf32>
    %61 = arith.addf %56, %60 : vector<8x128xf32>
    %cst_30 = arith.constant dense<0.000000e+00> : vector<8xf32>
    %62 = vector.multi_reduction <add>, %31, %cst_30 [1] : vector<8x128xf32> to vector<8xf32>
    %63 = vector.shape_cast %62 : vector<8xf32> to vector<8x1xf32>
    %cst_31 = arith.constant dense<0.000000e+00> : vector<8xf32>
    %64 = vector.multi_reduction <add>, %61, %cst_31 [1] : vector<8x128xf32> to vector<8xf32>
    %65 = vector.shape_cast %64 : vector<8xf32> to vector<8x1xf32>
    %cst_32 = arith.constant 0.166666672 : f32
    %66 = vector.broadcast %cst_32 : f32 to vector<8x1xf32>
    %67 = arith.mulf %65, %66 : vector<8x1xf32>
    %68 = arith.subf %63, %67 : vector<8x1xf32>
    %69 = vector.broadcast %68 : vector<8x1xf32> to vector<8x128xf32>
    %70 = arith.addf %61, %69 : vector<8x128xf32>
    %c0_33 = arith.constant 0 : index
    %c0_34 = arith.constant 0 : index
    %71 = vector.load %arg6[%c0_33, %c0_34] : memref<8x128xf32, #tpu.memory_space<vmem>>, vector<8x128xf32>
    tpu.vector_store %arg6[%c0_33, %c0_34], %70 {strides = array<i32>} : memref<8x128xf32, #tpu.memory_space<vmem>>, vector<8x128xf32>,
    return
  }
  func.func @transform_0(%arg0: i32) -> (i32, i32) {
    %c0_i32 = arith.constant 0 : i32
    %c0_i32_0 = arith.constant 0 : i32
    return %arg0, %c0_i32 : i32, i32
  }
  func.func @transform_1(%arg0: i32) -> (i32, i32, i32) {
    %c0_i32 = arith.constant 0 : i32
    %c0_i32_0 = arith.constant 0 : i32
    %c0_i32_1 = arith.constant 0 : i32
    %c0_i32_2 = arith.constant 0 : i32
    return %c0_i32, %c0_i32_0, %c0_i32_1 : i32, i32, i32
  }
  func.func @transform_2(%arg0: i32) -> (i32, i32, i32) {
    %c0_i32 = arith.constant 0 : i32
    %c0_i32_0 = arith.constant 0 : i32
    %c0_i32_1 = arith.constant 0 : i32
    %c0_i32_2 = arith.constant 0 : i32
    return %c0_i32, %c0_i32_0, %c0_i32_1 : i32, i32, i32
  }
  func.func @transform_3(%arg0: i32) -> (i32, i32, i32) {
    %c0_i32 = arith.constant 0 : i32
    %c0_i32_0 = arith.constant 0 : i32
    %c0_i32_1 = arith.constant 0 : i32
    %c0_i32_2 = arith.constant 0 : i32
    return %c0_i32, %c0_i32_0, %c0_i32_1 : i32, i32, i32
  }
  func.func @transform_4(%arg0: i32) -> (i32, i32, i32) {
    %c0_i32 = arith.constant 0 : i32
    %c0_i32_0 = arith.constant 0 : i32
    %c0_i32_1 = arith.constant 0 : i32
    %c0_i32_2 = arith.constant 0 : i32
    return %c0_i32, %c0_i32_0, %c0_i32_1 : i32, i32, i32
  }
  func.func @transform_5(%arg0: i32) -> (i32, i32) {
    %c0_i32 = arith.constant 0 : i32
    %c0_i32_0 = arith.constant 0 : i32
    return %arg0, %c0_i32 : i32, i32
  }
}

</mosaic_0001>

<bundles_post_ra>
// kernel: critic_forward_encoded.1
= control target key start
LH: loop header
LB: loop body
LE: loop exit
PB: predicated region body
PF: predicated region fallthrough
CT: control target
= control target key end

     0   :  { %10 = vsyncpa [#allocation3], 0  ;;  %s766_s0 = inlined_call_operand.vmem [shape: bf16[8,32], index: 0, kind: input, shape index: {}]   ;;  %s767_s1 = inlined_call_operand.hbm [shape: bf16[2,32,32], index: 1, kind: input, shape index: {}]   ;;  %s768_s2 = inlined_call_operand.hbm [shape: bf16[2,32,32], index: 2, kind: input, shape index: {}]   ;;  %s769_s3 = inlined_call_operand.hbm [shape: bf16[2,32,128], index: 3, kind: input, shape index: {}]   ;;  %s770_s4 = inlined_call_operand.vmem [shape: f32[2,3,128], index: 4, kind: input, shape index: {}]   ;;  %s771_s5 = inlined_call_operand.hbm [shape: f32[8,128], index: 5, kind: output, shape index: {}]  }
   0x1   :  { %11 = vsyncpa [#allocation6], 0 }
   0x2   :  { %12 = vsyncpa [#allocation4], 0  ;;  %s667_s18 = smov [#allocation5]   ;;  %s668_s20 = smov [#allocation2]  }
   0x3   :  { %s32_s19 = sshll.u32 %s667_s18, 4  ;;  %s20_s21 = sshll.u32 %s668_s20, 4  ;;  %s33_s19 = int_to_ptr.vmem [resolvable:$true] %s32_s19  ;;  %s21_s21 = int_to_ptr.vmem [resolvable:$true] %s20_s21 }
   0x4   :  { %s589_s22 = scalar_lea.vmem %s33_s19, 512  ;;  %p594_p1 = scmp.lt.s32.totalorder %s33_s19, %s33_s19 }
   0x5   :  { %p590_p0 = scmp.ne.s32.totalorder %s33_s19, %s589_s22  ;;  %p595_p2 = scmp.lt.s32.totalorder %s589_s22, %s589_s22 }
   0x7   :  { %p596_p3 = por %p595_p2, %p594_p1 }
   0x9   :  { %p597_p4 = pnand %p596_p3, %p590_p0 }
   0xb   :  { %600 = shalt.err (!%p597_p4)
}
   0xc   :  { %s669_s23 = smov 64   ;;  %s670_s24 = smov 4  }
   0xd   :  { %38 = dma.hbm_to_vmem [thread:$0]  %s768_s2, 512, %s33_s19, [#allocation6], %s669_s23, %s669_s23, %s670_s24  }
   0xe   :  { %s609_s27 = scalar_lea.vmem %s21_s21, 512  ;;  %p614_p6 = scmp.lt.s32.totalorder %s21_s21, %s21_s21 }
   0xf   :  { %p610_p5 = scmp.ne.s32.totalorder %s21_s21, %s609_s27  ;;  %p615_p7 = scmp.lt.s32.totalorder %s609_s27, %s609_s27 }
  0x11   :  { %p616_p8 = por %p615_p7, %p614_p6 }
  0x13   :  { %p617_p9 = pnand %p616_p8, %p610_p5 }
  0x15   :  { %620 = shalt.err (!%p617_p9)
}
  0x16   :  { %26 = dma.hbm_to_vmem [thread:$0]  %s767_s1, 512, %s21_s21, [#allocation3], %s669_s23, %s669_s23, %s670_s24  }
  0x17   :  { %s671_s30 = smov [#allocation7]  }
  0x18   :  { %s44_s6 = sshll.u32 %s671_s30, 4  ;;  %s45_s6 = int_to_ptr.vmem [resolvable:$true] %s44_s6 }
  0x19   :  { %s629_s7 = scalar_lea.vmem %s45_s6, 512  ;;  %p634_p11 = scmp.lt.s32.totalorder %s45_s6, %s45_s6 }
  0x1a   :  { %p630_p10 = scmp.ne.s32.totalorder %s45_s6, %s629_s7  ;;  %p635_p12 = scmp.lt.s32.totalorder %s629_s7, %s629_s7 }
  0x1c   :  { %p636_p13 = por %p635_p12, %p634_p11 }
  0x1e   :  { %p637_p0 = pnand %p636_p13, %p630_p10 }
  0x20   :  { %640 = shalt.err (!%p637_p0)
}
  0x21   :  { %50 = dma.hbm_to_vmem [thread:$0]  %s769_s3, 512, %s45_s6, [#allocation6], %s669_s23, %s669_s23, %s670_s24  }
  0x22   :  { %661 = dma.done.wait [#allocation3], 512  }
  0x23   :  { %662 = vsyncadd [#allocation3], 4294966784 }
  0x24   :  { %663 = dma.done.wait [#allocation6], 1024  }
  0x25   :  { %664 = vsyncadd [#allocation6], 4294966272  ;;  %v672_v0 = vmov 0.0   ;;  %vm673_vm0 = vmmov 0   ;;  %v569_v1 = vld [vmem:[#allocation2 + $0x8] sm:$0xff]   ;;  %v570_v2 = vld [vmem:[#allocation2] sm:$0xff]   ;;  %v70_v7 = vlaneseq }
  0x26   :  { %513 = vmatprep.subr.bf16.mxu0 %v672_v0  ;;  %517 = vmatprep.mubr.msk.bf16.mxu0 %vm673_vm0, %v672_v0  ;;  %vm86_vm1 = vcmask 261120   ;;  %v571_v3 = vld [vmem:[#allocation5 + $0x8] sm:$0xff]   ;;  %v63_v4 = vld [vmem:[%s766_s0] sm:$0xf]  ;;  %v573_v17 = vld [vmem:[#allocation2 + $0x18] sm:$0xff]  }
  0x27   :  { %521 = vmatprep.subr.bf16.mxu1 %v672_v0  ;;  %525 = vmatprep.mubr.msk.bf16.mxu1 %vm673_vm0, %v672_v0  ;;  %v572_v5 = vld [vmem:[#allocation5] sm:$0xff]   ;;  %v575_v6 = vld [vmem:[#allocation7 + $0x8] sm:$0xff]   ;;  %v731_v8 = vshrl.u32 %v70_v7, 7  ;;  %v574_v20 = vld [vmem:[#allocation2 + $0x10] sm:$0xff]  }
  0x28   :  { %514 = vmatpush3.bf16.msra.mxu0 %v569_v1  ;;  %522 = vmatpush3.bf16.msra.mxu1 %v571_v3  ;;  %v737_v10 = vld [vmem:[%s770_s4] sm:$0x7]  ;;  %v65_v27 = vld [vmem:[%s770_s4 + $0x4] sm:$0x7]  ;;  %v577_v30 = vld [vmem:[#allocation5 + $0x18] sm:$0xff]   ;;  %s674_s4 = smov [#allocation8]  }
  0x29   :  { %515 = vmatprep.subr.bf16.mxu0 %v672_v0  ;;  %523 = vmatprep.subr.bf16.mxu1 %v672_v0  ;;  %v72_v9 = vsub.s32 0, %v731_v8  ;;  %v576_v21 = vld [vmem:[#allocation7] sm:$0xff]   ;;  %v138_v22 = vsub.s32 1, %v731_v8  ;;  %v578_v35 = vld [vmem:[#allocation5 + $0x10] sm:$0xff]   ;;  %v579_v42 = vld [vmem:[#allocation7 + $0x18] sm:$0xff]   ;;  %v203_v56 = vsub.s32 2, %v731_v8 }
  0x2a   :  { %v580_v43 = vld [vmem:[#allocation7 + $0x10] sm:$0xff]   ;;  %s467_s12 = sshll.u32 %s674_s4, 4  ;;  %s468_s12 = int_to_ptr.vmem [resolvable:$true] %s467_s12 }
  0x2b   :  { %v73_v11 = vrot.slane %v737_v10, %v72_v9  ;;  %v139_v23 = vrot.slane %v737_v10, %v138_v22  ;;  %v268_v32 = vrot.slane %v65_v27, %v72_v9  ;;  %v331_v47 = vrot.slane %v65_v27, %v138_v22  ;;  %s641_s13 = scalar_lea.vmem %s468_s12, 128  ;;  %p646_p2 = scmp.lt.s32.totalorder %s468_s12, %s468_s12 }
  0x2c   :  { %516 = vmatpush3.bf16.msra.mxu0 %v570_v2  ;;  %524 = vmatpush3.bf16.msra.mxu1 %v572_v5  ;;  %v397_v57 = vrot.slane %v65_v27, %v203_v56  ;;  %v204_v59 = vrot.slane %v737_v10, %v203_v56  ;;  %p642_p1 = scmp.ne.s32.totalorder %s468_s12, %s641_s13  ;;  %p647_p3 = scmp.lt.s32.totalorder %s641_s13, %s641_s13 }
  0x2d   :  { %529 = vmatprep.subr.bf16.mxu0 %v672_v0  ;;  %537 = vmatprep.subr.bf16.mxu1 %v672_v0 }
  0x2e   :  { %p648_p4 = por %p647_p3, %p646_p2 }
  0x2f   :  { %518 = vmatmul.mubr.msk.bf16.vlgmr.msra.gmra.mxu0 %vm86_vm1, %v63_v4 }
  0x30   :  { %533 = vmatprep.mubr.msk.bf16.mxu0 %vm673_vm0, %v672_v0  ;;  %530 = vmatpush3.bf16.msra.mxu0 %v575_v6  ;;  %p649_p5 = pnand %p648_p4, %p642_p1 }
  0x31   :  { %531 = vmatprep.subr.bf16.mxu0 %v672_v0 }
  0x34   :  { %532 = vmatpush3.bf16.msra.mxu0 %v576_v21 }
  0x35   :  { %545 = vmatprep.subr.bf16.mxu0 %v672_v0 }
  0xef   :  { %v124_v12 = vpop.f32.mrf.mxu0 }
  0xf0   :  { %v125_v13 = vadd.f32 %v124_v12, %v73_v11 }
  0xf1   :  { %v519_v14 = vpop.f32.mrf.mxu0 }
  0xf2   :  { %v130_v15 = vmax.f32 %v125_v13, 0.0 }
  0xf3   :  { %v127_v16 = vpop.f32.mrf.mxu0 }
  0xf4   :  { %v131_v18 = vpack.c.bf16 %v130_v15, %v130_v15 }
  0xf5   :  { %v520_v19 = vpop.f32.mrf.mxu0 }
  0xf6   :  { %526 = vmatmul.mubr.msk.bf16.vlgmr.msra.gmra.mxu1 %vm86_vm1, %v131_v18 }
  0xf7   :  { %538 = vmatpush3.bf16.msra.mxu1 %v573_v17  ;;  %541 = vmatprep.mubr.msk.bf16.mxu1 %vm673_vm0, %v672_v0 }
  0xf8   :  { %539 = vmatprep.subr.bf16.mxu1 %v672_v0 }
  0xfb   :  { %540 = vmatpush3.bf16.msra.mxu1 %v574_v20 }
  0xfc   :  { %553 = vmatprep.subr.bf16.mxu1 %v672_v0 }
  0xfe   :  { %542 = vmatmul.mubr.msk.bf16.vlgmr.msra.gmra.mxu1 %vm86_vm1, %v63_v4 }
  0xff   :  { %557 = vmatprep.mubr.msk.bf16.mxu1 %vm673_vm0, %v672_v0  ;;  %554 = vmatpush3.bf16.msra.mxu1 %v579_v42 }
 0x100   :  { %555 = vmatprep.subr.bf16.mxu1 %v672_v0 }
 0x103   :  { %556 = vmatpush3.bf16.msra.mxu1 %v580_v43 }
 0x1b6   :  { %v189_v24 = vpop.f32.mrf.mxu1 }
 0x1b7   :  { %v190_v25 = vadd.f32 %v189_v24, %v139_v23 }
 0x1b8   :  { %v527_v26 = vpop.f32.mrf.mxu1 }
 0x1b9   :  { %v195_v28 = vmax.f32 %v190_v25, 0.0 }
 0x1ba   :  { %v192_v29 = vpop.f32.mrf.mxu1 }
 0x1bb   :  { %v196_v31 = vpack.c.bf16 %v195_v28, %v195_v28 }
 0x1bc   :  { %v528_v33 = vpop.f32.mrf.mxu1 }
 0x1bd   :  { %534 = vmatmul.mubr.msk.bf16.vlgmr.msra.gmra.mxu0 %vm86_vm1, %v196_v31 }
 0x1be   :  { %546 = vmatpush3.bf16.msra.mxu0 %v577_v30  ;;  %v315_v34 = vpop.f32.mrf.mxu1  ;;  %549 = vmatprep.mubr.msk.bf16.mxu0 %vm673_vm0, %v672_v0 }
 0x1bf   :  { %v316_v36 = vadd.f32 %v315_v34, %v268_v32  ;;  %547 = vmatprep.subr.bf16.mxu0 %v672_v0 }
 0x1c0   :  { %v543_v37 = vpop.f32.mrf.mxu1 }
 0x1c1   :  { %v321_v38 = vmax.f32 %v316_v36, 0.0 }
 0x1c2   :  { %548 = vmatpush3.bf16.msra.mxu0 %v578_v35  ;;  %v318_v39 = vpop.f32.mrf.mxu1 }
 0x1c3   :  { %v322_v40 = vpack.c.bf16 %v321_v38, %v321_v38 }
 0x1c4   :  { %v544_v41 = vpop.f32.mrf.mxu1 }
 0x1c5   :  { %550 = vmatmul.mubr.msk.bf16.vlgmr.msra.gmra.mxu0 %vm86_vm1, %v322_v40 }
 0x27d   :  { %v254_v44 = vpop.f32.mrf.mxu0 }
 0x27e   :  { %v255_v63 = vadd.f32 %v254_v44, %v204_v59 }
 0x27f   :  { %v535_v45 = vpop.f32.mrf.mxu0 }
 0x281   :  { %v257_v46 = vpop.f32.mrf.mxu0 }
 0x283   :  { %v536_v48 = vpop.f32.mrf.mxu0 }
 0x285   :  { %v381_v49 = vpop.f32.mrf.mxu0 }
 0x286   :  { %v382_v50 = vadd.f32 %v381_v49, %v331_v47 }
 0x287   :  { %v551_v51 = vpop.f32.mrf.mxu0 }
 0x288   :  { %v387_v52 = vmax.f32 %v382_v50, 0.0 }
 0x289   :  { %v384_v53 = vpop.f32.mrf.mxu0 }
 0x28a   :  { %v388_v54 = vpack.c.bf16 %v387_v52, %v387_v52 }
 0x28b   :  { %v552_v55 = vpop.f32.mrf.mxu0 }
 0x28c   :  { %558 = vmatmul.mubr.msk.bf16.vlgmr.msra.gmra.mxu1 %vm86_vm1, %v388_v54 }
 0x34c   :  { %v447_v58 = vpop.f32.mrf.mxu1 }
 0x34d   :  { %v448_v60 = vadd.f32 %v447_v58, %v397_v57 }
 0x34e   :  { %v559_v61 = vpop.f32.mrf.mxu1 }
 0x34f   :  { %455 = vadd.xlane.f32.xlu0 %v448_v60 }
 0x350   :  { %v450_v62 = vpop.f32.mrf.mxu1 }
 0x352   :  { %v560_v0 = vpop.f32.mrf.mxu1 }
 0x353   :  { %453 = vadd.xlane.f32.xlu0 %v255_v63 }
 0x3d8   :  { %v456_v1 = vpop.xlane.xlu0 %455 }
 0x3d9   :  { %v457_v2 = vmul.f32 0.16666667, %v456_v1 }
 0x3dc   :  { %v454_v3 = vpop.xlane.xlu0 %453 }
 0x3dd   :  { %v458_v4 = vsub.f32 %v454_v3, %v457_v2 }
 0x3df   :  { %v459_v5 = vadd.f32 %v458_v4, %v448_v60 }
 0x3e1   :  { %460 = vst [vmem:[#allocation8] sm:$0xff] %v459_v5 }
 0x3e2   :  { %652 = shalt.err (!%p649_p5)
}
 0x3e3   :  { %470 = dma.vmem_to_hbm [thread:$0]  %s468_s12, 128, %s771_s5, [#allocation4]  }
 0x3e4   :  { %665 = dma.done.wait [#allocation4], 128  }
 0x3e5   :  { %666 = vsyncadd [#allocation4], 4294967168 }
 0x3e6   :  { %474 = vsyncpa [#allocation3], 1 }
 0x3e7   :  { %475 = vsyncpa [#allocation6], 1 }
 0x3e8   :  { %476 = vsyncpa [#allocation4], 1 }

</bundles_post_ra>
